<compile_context>
chip_gen: v5e
topology: v5e:2x2
jax: 0.10.0
libtpu: 0.0.40
codegen_flags: <defaults>
</compile_context>

<pallas_src>
import functools
import math

import jax
import jax.numpy as jnp
from jax import lax
from jax.experimental import pallas as pl
from jax.experimental.pallas import tpu as pltpu


# --------------------------------------------------------------------------- kernel
def _inverted_residual_kernel(*refs, has_expand, stride, use_res,
                              Bt, H, W, hidden_p, mxu_dtype):
    it = iter(refs)
    x_ref = next(it)
    if has_expand:
        w1b_ref, b1t_ref = next(it), next(it)
    wdt_ref, bdt_ref = next(it), next(it)
    srow_ref = next(it) if stride == 2 else None
    w2b_ref, b2t_ref = next(it), next(it)
    o_ref = next(it)

    M = Bt * H
    L = W * hidden_p

    if Bt == 1:
        x = x_ref[0]                                        # (H, W*Cin_p) f32
    else:
        # H % 8 == 0 guaranteed by the batch-tile picker: only sublane dims merge.
        x = x_ref[...].reshape(M, x_ref.shape[2])           # (Bt*H, W*Cin_p) f32

    # ---- 1x1 expand conv (BN folded into weight) + ReLU6: block-diag matmul (MXU) ----
    if has_expand:
        y = jnp.dot(x.astype(mxu_dtype), w1b_ref[...],
                    preferred_element_type=jnp.float32)     # (M, W*hidden_p) f32
        y = jnp.clip(y + b1t_ref[...], 0.0, 6.0)
    else:
        y = x                                               # hidden_p == Cin_p

    # ---- 3x3 depthwise conv (pad=1, stride-1) + bias + ReLU6, fully in registers ----
    # Left/right image-border zeros are pre-folded into wdt's per-lane weights; only
    # the top/bottom row masks remain, computed from the in-image row index.
    row = lax.broadcasted_iota(jnp.int32, (M, 1), 0) % H
    not_top = (row >= 1).astype(jnp.float32)                # (M, 1)
    not_bot = (row <= H - 2).astype(jnp.float32)

    wdt = wdt_ref[...]                                      # (9, L) f32, BN+border folded
    # 8 rolls total: 2 lane rolls shared by all off-center-column taps, 6 row rolls.
    yl = pltpu.roll(y, shift=hidden_p % L, axis=1)          # column j-1  (sj = -1)
    yr = pltpu.roll(y, shift=(L - hidden_p) % L, axis=1)    # column j+1  (sj = +1)
    yu = pltpu.roll(y, shift=1, axis=0)                     # row i-1     (si = -1)
    ylu = pltpu.roll(yl, shift=1, axis=0)
    yru = pltpu.roll(yr, shift=1, axis=0)
    yd = pltpu.roll(y, shift=M - 1, axis=0)                 # row i+1     (si = +1)
    yld = pltpu.roll(yl, shift=M - 1, axis=0)
    yrd = pltpu.roll(yr, shift=M - 1, axis=0)

    mid = y * wdt[4:5, :] + yl * wdt[3:4, :] + yr * wdt[5:6, :] + bdt_ref[...]
    top = ylu * wdt[0:1, :] + yu * wdt[1:2, :] + yru * wdt[2:3, :]
    bot = yld * wdt[6:7, :] + yd * wdt[7:8, :] + yrd * wdt[8:9, :]
    z = jnp.clip(mid + not_top * top + not_bot * bot, 0.0, 6.0)   # (M, L) f32

    # ---- stride==2: decimate rows with a 0/1 selection matmul (block-diag over Bt);
    #      column decimation is folded into the block-diagonal project weight. ----
    zc = z.astype(mxu_dtype)
    if stride == 2:
        zc = jnp.dot(srow_ref[...], zc,
                     preferred_element_type=jnp.float32).astype(mxu_dtype)  # (Bt*Ho, L)

    # ---- 1x1 project conv (BN folded into weight), no activation ----
    out = jnp.dot(zc, w2b_ref[...], preferred_element_type=jnp.float32)     # (Bt*Ho, Wo*Cout_p)
    out = out + b2t_ref[...]

    if use_res:                                             # stride==1 and Cin==Cout
        out = out + x                                       # f32 residual (pad lanes are 0)

    if Bt == 1:
        o_ref[0] = out.astype(o_ref.dtype)
    else:
        o_ref[...] = out.reshape(Bt, out.shape[0] // Bt, out.shape[1]).astype(o_ref.dtype)


# --------------------------------------------------------------------------- packing
def _pad_channels(c, w):
    """Smallest c_p >= c such that (w * c_p) % 128 == 0 (lane-dense width is 128-dense)."""
    m = 128 // math.gcd(w, 128)
    return ((c + m - 1) // m) * m


def _pick_batch_tile(N, H, Ho):
    """Largest divisor of N with Bt*H <= 256 (v6e/v7x MXU rows).  Only fold when the
    in-kernel (Bt,H,L) -> (Bt*H,L) reshape is sublane-exact (H % 8 == 0, Ho % 8 == 0)."""
    if H % 8 != 0 or Ho % 8 != 0:
        return 1
    target = max(1, 256 // H)
    best = 1
    for cand in range(1, min(N, target) + 1):
        if N % cand == 0:
            best = cand
    return best


def pack_inverted_residual(params, x_shape, *, stride, expand_ratio,
                           mxu_dtype=jnp.bfloat16, batch_tile=None):
    """Build BN-folded, lane-dense, block-diagonal weights once per layer (hoisted out
    of the per-call path).  Returns (packed_arrays, static_meta)."""
    assert stride in (1, 2)
    f32 = jnp.float32
    N, Cin, H, W = x_shape
    has_expand = expand_ratio != 1
    hidden = Cin * expand_ratio
    Cout = params["w2"].shape[1]
    Ho = (H - 1) // stride + 1
    Wo = (W - 1) // stride + 1
    use_res = (stride == 1) and (Cin == Cout)

    # channel zero-padding so every lane-dense width is a multiple of 128
    Cin_p = _pad_channels(Cin, W)
    hidden_p = Cin_p if not has_expand else _pad_channels(hidden, W)
    Cout_p = _pad_channels(Cout, Wo)

    if batch_tile is None:
        batch_tile = _pick_batch_tile(N, H, Ho)
    assert N % batch_tile == 0, "batch_tile must divide N"
    Bt = batch_tile

    packed = {}

    if has_expand:
        w1_eff = params["w1"].astype(f32) * params["s1"].reshape(1, hidden)
        w1 = jnp.zeros((Cin_p, hidden_p), f32).at[:Cin, :hidden].set(w1_eff)
        packed["w1b"] = jnp.kron(jnp.eye(W, dtype=f32), w1).astype(mxu_dtype)  # (W*Cin_p, W*hid_p)
        b1 = jnp.zeros((1, hidden_p), f32).at[:, :hidden].set(
            params["b1"].reshape(1, hidden).astype(f32))
        packed["b1t"] = jnp.tile(b1, (1, W))

    wd_eff = (params["wd"].astype(f32) * params["sd"].reshape(1, 1, hidden)).reshape(9, hidden)
    wd = jnp.zeros((9, hidden_p), f32).at[:, :hidden].set(wd_eff)
    wdt = jnp.tile(wd, (1, W))                                   # (9, W*hidden_p)
    # Fold left/right zero-padding of the image border into the per-lane weights:
    #   sj=-1 taps (k = 0,3,6) are invalid for output column 0
    #   sj=+1 taps (k = 2,5,8) are invalid for output column W-1
    lane_col = jnp.arange(W * hidden_p, dtype=jnp.int32) // hidden_p
    not_left = (lane_col >= 1).astype(f32)[None, :]
    not_right = (lane_col <= W - 2).astype(f32)[None, :]
    sj = jnp.array([-1, 0, 1] * 3, f32)[:, None]
    wdt = wdt * jnp.where(sj < 0, not_left, jnp.where(sj > 0, not_right, 1.0))
    packed["wdt"] = wdt
    bd = jnp.zeros((1, hidden_p), f32).at[:, :hidden].set(
        params["bd"].reshape(1, hidden).astype(f32))
    packed["bdt"] = jnp.tile(bd, (1, W))

    if stride == 2:
        srow = jnp.zeros((Ho, H), f32).at[jnp.arange(Ho), stride * jnp.arange(Ho)].set(1.0)
        packed["srow"] = jnp.kron(jnp.eye(Bt, dtype=f32), srow).astype(mxu_dtype)  # (Bt*Ho, Bt*H)

    col_sel = jnp.zeros((W, Wo), f32).at[stride * jnp.arange(Wo), jnp.arange(Wo)].set(1.0)
    w2_eff = params["w2"].astype(f32) * params["s2"].reshape(1, Cout)
    w2 = jnp.zeros((hidden_p, Cout_p), f32).at[:hidden, :Cout].set(w2_eff)
    packed["w2b"] = jnp.kron(col_sel, w2).astype(mxu_dtype)      # (W*hidden_p, Wo*Cout_p)
    b2 = jnp.zeros((1, Cout_p), f32).at[:, :Cout].set(params["b2"].reshape(1, Cout).astype(f32))
    packed["b2t"] = jnp.tile(b2, (1, Wo))

    meta = dict(N=N, Cin=Cin, H=H, W=W, Ho=Ho, Wo=Wo, Cout=Cout,
                Cin_p=Cin_p, hidden_p=hidden_p, Cout_p=Cout_p, Bt=Bt,
                stride=stride, has_expand=has_expand, use_res=use_res,
                mxu_dtype=mxu_dtype)
    return packed, meta


# --------------------------------------------------------------------------- forward
def inverted_residual_apply(x_nchw, packed, meta):
    """InvertedResidual forward. x_nchw: (N, Cin, H, W) f32 -> (N, Cout, Ho, Wo) f32."""
    f32 = jnp.float32
    m = meta
    N, Cin, H, W = m["N"], m["Cin"], m["H"], m["W"]
    Ho, Wo, Cout = m["Ho"], m["Wo"], m["Cout"]
    Cin_p, hidden_p, Cout_p, Bt = m["Cin_p"], m["hidden_p"], m["Cout_p"], m["Bt"]
    assert x_nchw.shape == (N, Cin, H, W)

    x = jnp.transpose(x_nchw, (0, 2, 3, 1)).astype(f32)          # NHWC
    if Cin_p > Cin:
        x = jnp.pad(x, ((0, 0), (0, 0), (0, 0), (0, Cin_p - Cin)))
    x_ld = x.reshape(N, H, W * Cin_p)                            # lane-dense input slab

    inputs = [x_ld]
    in_specs = [pl.BlockSpec((Bt, H, W * Cin_p), lambda n: (n, 0, 0))]

    def const_spec(arr):
        # TODO(synk): single-buffer these constant operands (pipeline_mode=pl.Buffered(1)
        # or a one-shot DMA into scratch) once VMEM gets tight at yolact-scale shapes.
        return pl.BlockSpec(arr.shape, lambda n: (0, 0))

    if m["has_expand"]:
        inputs += [packed["w1b"], packed["b1t"]]
        in_specs += [const_spec(packed["w1b"]), const_spec(packed["b1t"])]
    inputs += [packed["wdt"], packed["bdt"]]
    in_specs += [const_spec(packed["wdt"]), const_spec(packed["bdt"])]
    if m["stride"] == 2:
        inputs += [packed["srow"]]
        in_specs += [const_spec(packed["srow"])]
    inputs += [packed["w2b"], packed["b2t"]]
    in_specs += [const_spec(packed["w2b"]), const_spec(packed["b2t"])]

    kernel = functools.partial(
        _inverted_residual_kernel, has_expand=m["has_expand"], stride=m["stride"],
        use_res=m["use_res"], Bt=Bt, H=H, W=W, hidden_p=hidden_p,
        mxu_dtype=m["mxu_dtype"])

    # Explicit scoped-VMEM budget (v7x: 64 MiB physical / 32 MiB default scoped).
    def _nb(shape, itemsize=4):
        return int(math.prod(shape)) * itemsize
    vmem = 2 * _nb((Bt, H, W * Cin_p)) + 2 * _nb((Bt, Ho, Wo * Cout_p))
    for a in inputs[1:]:
        vmem += 2 * int(a.size) * a.dtype.itemsize
    vmem += 12 * _nb((Bt * H, W * hidden_p))     # in-kernel f32 intermediates headroom
    vmem_limit = int(min(max(vmem, 16 << 20), 32 << 20))

    out_ld = pl.pallas_call(
        kernel,
        out_shape=jax.ShapeDtypeStruct((N, Ho, Wo * Cout_p), f32),
        grid_spec=pltpu.PrefetchScalarGridSpec(
            num_scalar_prefetch=0,
            grid=(N // Bt,),
            in_specs=in_specs,
            out_specs=pl.BlockSpec((Bt, Ho, Wo * Cout_p), lambda n: (n, 0, 0)),
        ),
        compiler_params=pltpu.CompilerParams(
            dimension_semantics=("parallel",),   # batch-tile grid; sharded across TCs on v7x
            vmem_limit_bytes=vmem_limit),
    )(*inputs)

    out = out_ld.reshape(N, Ho, Wo, Cout_p)[..., :Cout]
    return jnp.transpose(out, (0, 3, 1, 2))                      # back to NCHW


def inverted_residual_pallas(x_nchw, params, *, stride, expand_ratio,
                             mxu_dtype=jnp.bfloat16, batch_tile=None):
    """Convenience one-shot wrapper (packs weights per call; prefer pack+apply)."""
    packed, meta = pack_inverted_residual(
        params, x_nchw.shape, stride=stride, expand_ratio=expand_ratio,
        mxu_dtype=mxu_dtype, batch_tile=batch_tile)
    return inverted_residual_apply(x_nchw, packed, meta)


# --------------------------------------------------------------------------- reference
def inverted_residual_ref(x_nchw, params, *, stride, expand_ratio,
                          mxu_dtype=jnp.float32):
    """Module forward with BN folded to scale/bias (algebraically identical).
    mxu_dtype=f32  -> exact f32 module semantics.
    mxu_dtype=bf16 -> same bf16 quantization of the 1x1-conv inputs as the kernel's
                      perf mode (f32 accumulation / f32 depthwise everywhere)."""
    x = jnp.transpose(x_nchw, (0, 2, 3, 1)).astype(jnp.float32)
    _, _, _, Cin = x.shape
    hidden = Cin * expand_ratio
    Cout = params["w2"].shape[1]
    dn = ("NHWC", "HWIO", "NHWC")
    hi = lax.Precision.HIGHEST
    y = x
    if expand_ratio != 1:
        w1_eff = (params["w1"] * params["s1"].reshape(1, hidden)).astype(mxu_dtype)
        y = lax.conv_general_dilated(
            y.astype(mxu_dtype), w1_eff.reshape(1, 1, Cin, hidden), (1, 1), "SAME",
            dimension_numbers=dn, precision=hi, preferred_element_type=jnp.float32)
        y = jnp.clip(y + params["b1"].reshape(hidden), 0.0, 6.0)
    wd_eff = params["wd"] * params["sd"].reshape(1, 1, hidden)
    y = lax.conv_general_dilated(
        y, wd_eff.reshape(3, 3, 1, hidden), (stride, stride), ((1, 1), (1, 1)),
        dimension_numbers=dn, feature_group_count=hidden, precision=hi,
        preferred_element_type=jnp.float32)
    y = jnp.clip(y + params["bd"].reshape(hidden), 0.0, 6.0)
    w2_eff = (params["w2"] * params["s2"].reshape(1, Cout)).astype(mxu_dtype)
    y = lax.conv_general_dilated(
        y.astype(mxu_dtype), w2_eff.reshape(1, 1, hidden, Cout), (1, 1), "SAME",
        dimension_numbers=dn, precision=hi, preferred_element_type=jnp.float32)
    y = y + params["b2"].reshape(Cout)
    if stride == 1 and Cin == Cout:
        y = y + x
    return jnp.transpose(y, (0, 3, 1, 2))


def _fold_bn(gamma, beta, mean, var, eps=1e-5):
    scale = gamma / jnp.sqrt(var + eps)
    bias = beta - mean * scale
    return scale.reshape(1, -1), bias.reshape(1, -1)


def make_params(key, inp, oup, expand_ratio):
    hidden = inp * expand_ratio
    ks = jax.random.split(key, 15)
    params = {}
    params["w1"] = jax.random.normal(ks[0], (inp, hidden), jnp.float32) * 0.2
    params["s1"], params["b1"] = _fold_bn(
        jax.random.uniform(ks[1], (hidden,), minval=0.5, maxval=1.5),
        jax.random.normal(ks[2], (hidden,)) * 0.1,
        jax.random.normal(ks[3], (hidden,)) * 0.1,
        jax.random.uniform(ks[4], (hidden,), minval=0.5, maxval=1.5))
    params["wd"] = jax.random.normal(ks[5], (3, 3, hidden), jnp.float32) * 0.2
    params["sd"], params["bd"] = _fold_bn(
        jax.random.uniform(ks[6], (hidden,), minval=0.5, maxval=1.5),
        jax.random.normal(ks[7], (hidden,)) * 0.1,
        jax.random.normal(ks[8], (hidden,)) * 0.1,
        jax.random.uniform(ks[9], (hidden,), minval=0.5, maxval=1.5))
    params["w2"] = jax.random.normal(ks[10], (hidden, oup), jnp.float32) * 0.2
    params["s2"], params["b2"] = _fold_bn(
        jax.random.uniform(ks[11], (oup,), minval=0.5, maxval=1.5),
        jax.random.normal(ks[12], (oup,)) * 0.1,
        jax.random.normal(ks[13], (oup,)) * 0.1,
        jax.random.uniform(ks[14], (oup,), minval=0.5, maxval=1.5))
    return params


if __name__ == "__main__":
    key = jax.random.PRNGKey(0)
    N, H, W = 2, 16, 16
    configs = [
        # (inp, oup, stride, expand_ratio)
        (4, 4, 1, 2),    # expand + residual connection (needs channel pad 4 -> 8)
        (8, 16, 2, 2),   # expand, stride 2, no residual
        (8, 8, 1, 1),    # no expand (expand_ratio == 1), residual
    ]
    for inp, oup, stride, expand_ratio in configs:
        key, k_x, k_p = jax.random.split(key, 3)
        x = jax.random.normal(k_x, (N, inp, H, W), jnp.float32)
        params = make_params(k_p, inp, oup, expand_ratio)

        # (a) exact-f32 verification mode: must match the f32 module forward tightly.
        packed32, meta32 = pack_inverted_residual(
            params, x.shape, stride=stride, expand_ratio=expand_ratio,
            mxu_dtype=jnp.float32)
        out = jax.block_until_ready(inverted_residual_apply(x, packed32, meta32))
        ref = inverted_residual_ref(x, params, stride=stride,
                                    expand_ratio=expand_ratio, mxu_dtype=jnp.float32)
        assert out.shape == ref.shape == (N, oup, H // stride, W // stride)
        err = float(jnp.max(jnp.abs(out - ref)))
        assert jnp.allclose(out, ref, atol=1e-4, rtol=1e-4), (
            "f32 mode mismatch", stride, expand_ratio, err)

        # (b) bf16-MXU perf mode (default): checked against a reference that applies
        #     the same bf16 input quantization (f32 accumulation, f32 depthwise).
        packed16, meta16 = pack_inverted_residual(
            params, x.shape, stride=stride, expand_ratio=expand_ratio,
            mxu_dtype=jnp.bfloat16)
        out_b = jax.block_until_ready(inverted_residual_apply(x, packed16, meta16))
        ref_b = inverted_residual_ref(x, params, stride=stride,
                                      expand_ratio=expand_ratio, mxu_dtype=jnp.bfloat16)
        err_b = float(jnp.max(jnp.abs(out_b - ref_b)))
        assert jnp.allclose(out_b, ref_b, atol=5e-2, rtol=5e-2), (
            "bf16 mode mismatch", stride, expand_ratio, err_b)

    print("KERNEL_OK")
</pallas_src>

<mosaic_0001>
module attributes {stable_mosaic.version = 11 : i64} {
  func.func @_inverted_residual_kernel(%arg0: i32, %arg1: memref<2x16x128xf32, #tpu.memory_space<vmem>>, %arg2: memref<128x128xf32, #tpu.memory_space<vmem>>, %arg3: memref<1x128xf32, #tpu.memory_space<vmem>>, %arg4: memref<9x128xf32, #tpu.memory_space<vmem>>, %arg5: memref<1x128xf32, #tpu.memory_space<vmem>>, %arg6: memref<128x128xf32, #tpu.memory_space<vmem>>, %arg7: memref<1x128xf32, #tpu.memory_space<vmem>>, %arg8: memref<2x16x128xf32, #tpu.memory_space<vmem>>) attributes {dimension_semantics = [#tpu.dimension_semantics<parallel>], iteration_bounds = array<i64: 1>, scalar_prefetch = 0 : i64, scratch_operands = 0 : i64, tpu.core_type = #tpu.core_type<tc>, window_params = [{transform_indices = @transform_0, window_bounds = array<i64: 2, 16, 128>}, {pipeline_mode = #tpu.pipeline_mode<synchronous>, transform_indices = @transform_1, window_bounds = array<i64: 128, 128>}, {pipeline_mode = #tpu.pipeline_mode<synchronous>, transform_indices = @transform_2, window_bounds = array<i64: 1, 128>}, {pipeline_mode = #tpu.pipeline_mode<synchronous>, transform_indices = @transform_3, window_bounds = array<i64: 9, 128>}, {pipeline_mode = #tpu.pipeline_mode<synchronous>, transform_indices = @transform_4, window_bounds = array<i64: 1, 128>}, {pipeline_mode = #tpu.pipeline_mode<synchronous>, transform_indices = @transform_5, window_bounds = array<i64: 128, 128>}, {pipeline_mode = #tpu.pipeline_mode<synchronous>, transform_indices = @transform_6, window_bounds = array<i64: 1, 128>}, {transform_indices = @transform_7, window_bounds = array<i64: 2, 16, 128>}]} {
    %c0 = arith.constant 0 : index
    %c0_0 = arith.constant 0 : index
    %c0_1 = arith.constant 0 : index
    %0 = vector.load %arg1[%c0, %c0_0, %c0_1] : memref<2x16x128xf32, #tpu.memory_space<vmem>>, vector<2x16x128xf32>
    %1 = vector.shape_cast %0 : vector<2x16x128xf32> to vector<32x128xf32>
    %c0_2 = arith.constant 0 : index
    %c0_3 = arith.constant 0 : index
    %2 = vector.load %arg2[%c0_2, %c0_3] : memref<128x128xf32, #tpu.memory_space<vmem>>, vector<128x128xf32>
    %cst = arith.constant dense<0.000000e+00> : vector<32x128xf32>
    %3 = tpu.matmul %1, %2, %cst {dimension_numbers = #tpu.dot_dimension_numbers<[1], [0], [0], [1], [0, 0, 1, 1], [], []>} : vector<32x128xf32>, vector<128x128xf32>, vector<32x128xf32> -> vector<32x128xf32>
    %c0_4 = arith.constant 0 : index
    %c0_5 = arith.constant 0 : index
    %4 = vector.load %arg3[%c0_4, %c0_5] : memref<1x128xf32, #tpu.memory_space<vmem>>, vector<1x128xf32>
    %5 = vector.broadcast %4 : vector<1x128xf32> to vector<32x128xf32>
    %6 = arith.addf %3, %5 : vector<32x128xf32>
    %cst_6 = arith.constant 0.000000e+00 : f32
    %cst_7 = arith.constant 6.000000e+00 : f32
    %7 = vector.broadcast %cst_6 : f32 to vector<32x128xf32>
    %8 = arith.maximumf %7, %6 : vector<32x128xf32>
    %9 = vector.broadcast %cst_7 : f32 to vector<32x128xf32>
    %10 = arith.minimumf %9, %8 : vector<32x128xf32>
    %11 = tpu.iota {dimensions = array<i32: 0>} : vector<32x1xi32>
    %c16_i32 = arith.constant 16 : i32
    %c0_i32 = arith.constant 0 : i32
    %12 = arith.cmpi eq, %c16_i32, %c0_i32 : i32
    %c1_i32 = arith.constant 1 : i32
    %13 = arith.select %12, %c1_i32, %c16_i32 : i32
    %14 = vector.broadcast %13 : i32 to vector<32x1xi32>
    %15 = arith.remsi %11, %14 : vector<32x1xi32>
    %c0_i32_8 = arith.constant 0 : i32
    %16 = vector.broadcast %c0_i32_8 : i32 to vector<32x1xi32>
    %17 = arith.cmpi ne, %15, %16 : vector<32x1xi32>
    %c0_i32_9 = arith.constant 0 : i32
    %18 = vector.broadcast %c0_i32_9 : i32 to vector<32x1xi32>
    %19 = arith.cmpi slt, %15, %18 : vector<32x1xi32>
    %c0_i32_10 = arith.constant 0 : i32
    %20 = arith.cmpi slt, %13, %c0_i32_10 : i32
    %21 = vector.broadcast %20 : i1 to vector<32x1xi1>
    %22 = vector.broadcast %21 : vector<32x1xi1> to vector<32x1xi1>
    %23 = arith.xori %19, %22 : vector<32x1xi1>
    %24 = arith.andi %23, %17 : vector<32x1xi1>
    %25 = vector.broadcast %13 : i32 to vector<32x1xi32>
    %26 = arith.addi %15, %25 : vector<32x1xi32>
    %27 = arith.select %24, %26, %15 : vector<32x1xi1>, vector<32x1xi32>
    %c1_i32_11 = arith.constant 1 : i32
    %28 = vector.broadcast %c1_i32_11 : i32 to vector<32x1xi32>
    %29 = arith.cmpi sge, %27, %28 : vector<32x1xi32>
    %30 = arith.extui %29 : vector<32x1xi1> to vector<32x1xi32>
    %31 = arith.sitofp %30 : vector<32x1xi32> to vector<32x1xf32>
    %c14_i32 = arith.constant 14 : i32
    %32 = vector.broadcast %c14_i32 : i32 to vector<32x1xi32>
    %33 = arith.cmpi sle, %27, %32 : vector<32x1xi32>
    %34 = arith.extui %33 : vector<32x1xi1> to vector<32x1xi32>
    %35 = arith.sitofp %34 : vector<32x1xi32> to vector<32x1xf32>
    %c0_12 = arith.constant 0 : index
    %c0_13 = arith.constant 0 : index
    %36 = vector.load %arg4[%c0_12, %c0_13] : memref<9x128xf32, #tpu.memory_space<vmem>>, vector<9x128xf32>
    %c8_i32 = arith.constant 8 : i32
    %37 = tpu.dynamic_rotate %10 by %c8_i32 dim 1 : vector<32x128xf32>, i32 -> vector<32x128xf32>
    %c120_i32 = arith.constant 120 : i32
    %38 = tpu.dynamic_rotate %10 by %c120_i32 dim 1 : vector<32x128xf32>, i32 -> vector<32x128xf32>
    %c1_i32_14 = arith.constant 1 : i32
    %39 = tpu.dynamic_rotate %10 by %c1_i32_14 dim 0 : vector<32x128xf32>, i32 -> vector<32x128xf32>
    %c1_i32_15 = arith.constant 1 : i32
    %40 = tpu.dynamic_rotate %37 by %c1_i32_15 dim 0 : vector<32x128xf32>, i32 -> vector<32x128xf32>
    %c1_i32_16 = arith.constant 1 : i32
    %41 = tpu.dynamic_rotate %38 by %c1_i32_16 dim 0 : vector<32x128xf32>, i32 -> vector<32x128xf32>
    %c31_i32 = arith.constant 31 : i32
    %42 = tpu.dynamic_rotate %10 by %c31_i32 dim 0 : vector<32x128xf32>, i32 -> vector<32x128xf32>
    %c31_i32_17 = arith.constant 31 : i32
    %43 = tpu.dynamic_rotate %37 by %c31_i32_17 dim 0 : vector<32x128xf32>, i32 -> vector<32x128xf32>
    %c31_i32_18 = arith.constant 31 : i32
    %44 = tpu.dynamic_rotate %38 by %c31_i32_18 dim 0 : vector<32x128xf32>, i32 -> vector<32x128xf32>
    %45 = vector.extract_strided_slice %36 {offsets = [4, 0], sizes = [1, 128], strides = [1, 1]} : vector<9x128xf32> to vector<1x128xf32>
    %46 = vector.broadcast %45 : vector<1x128xf32> to vector<32x128xf32>
    %47 = arith.mulf %10, %46 : vector<32x128xf32>
    %48 = vector.extract_strided_slice %36 {offsets = [3, 0], sizes = [1, 128], strides = [1, 1]} : vector<9x128xf32> to vector<1x128xf32>
    %49 = vector.broadcast %48 : vector<1x128xf32> to vector<32x128xf32>
    %50 = arith.mulf %37, %49 : vector<32x128xf32>
    %51 = arith.addf %47, %50 : vector<32x128xf32>
    %52 = vector.extract_strided_slice %36 {offsets = [5, 0], sizes = [1, 128], strides = [1, 1]} : vector<9x128xf32> to vector<1x128xf32>
    %53 = vector.broadcast %52 : vector<1x128xf32> to vector<32x128xf32>
    %54 = arith.mulf %38, %53 : vector<32x128xf32>
    %55 = arith.addf %51, %54 : vector<32x128xf32>
    %c0_19 = arith.constant 0 : index
    %c0_20 = arith.constant 0 : index
    %56 = vector.load %arg5[%c0_19, %c0_20] : memref<1x128xf32, #tpu.memory_space<vmem>>, vector<1x128xf32>
    %57 = vector.broadcast %56 : vector<1x128xf32> to vector<32x128xf32>
    %58 = arith.addf %55, %57 : vector<32x128xf32>
    %59 = vector.extract_strided_slice %36 {offsets = [0, 0], sizes = [1, 128], strides = [1, 1]} : vector<9x128xf32> to vector<1x128xf32>
    %60 = vector.broadcast %59 : vector<1x128xf32> to vector<32x128xf32>
    %61 = arith.mulf %40, %60 : vector<32x128xf32>
    %62 = vector.extract_strided_slice %36 {offsets = [1, 0], sizes = [1, 128], strides = [1, 1]} : vector<9x128xf32> to vector<1x128xf32>
    %63 = vector.broadcast %62 : vector<1x128xf32> to vector<32x128xf32>
    %64 = arith.mulf %39, %63 : vector<32x128xf32>
    %65 = arith.addf %61, %64 : vector<32x128xf32>
    %66 = vector.extract_strided_slice %36 {offsets = [2, 0], sizes = [1, 128], strides = [1, 1]} : vector<9x128xf32> to vector<1x128xf32>
    %67 = vector.broadcast %66 : vector<1x128xf32> to vector<32x128xf32>
    %68 = arith.mulf %41, %67 : vector<32x128xf32>
    %69 = arith.addf %65, %68 : vector<32x128xf32>
    %70 = vector.extract_strided_slice %36 {offsets = [6, 0], sizes = [1, 128], strides = [1, 1]} : vector<9x128xf32> to vector<1x128xf32>
    %71 = vector.broadcast %70 : vector<1x128xf32> to vector<32x128xf32>
    %72 = arith.mulf %43, %71 : vector<32x128xf32>
    %73 = vector.extract_strided_slice %36 {offsets = [7, 0], sizes = [1, 128], strides = [1, 1]} : vector<9x128xf32> to vector<1x128xf32>
    %74 = vector.broadcast %73 : vector<1x128xf32> to vector<32x128xf32>
    %75 = arith.mulf %42, %74 : vector<32x128xf32>
    %76 = arith.addf %72, %75 : vector<32x128xf32>
    %77 = vector.extract_strided_slice %36 {offsets = [8, 0], sizes = [1, 128], strides = [1, 1]} : vector<9x128xf32> to vector<1x128xf32>
    %78 = vector.broadcast %77 : vector<1x128xf32> to vector<32x128xf32>
    %79 = arith.mulf %44, %78 : vector<32x128xf32>
    %80 = arith.addf %76, %79 : vector<32x128xf32>
    %81 = vector.broadcast %31 : vector<32x1xf32> to vector<32x128xf32>
    %82 = arith.mulf %81, %69 : vector<32x128xf32>
    %83 = arith.addf %58, %82 : vector<32x128xf32>
    %84 = vector.broadcast %35 : vector<32x1xf32> to vector<32x128xf32>
    %85 = arith.mulf %84, %80 : vector<32x128xf32>
    %86 = arith.addf %83, %85 : vector<32x128xf32>
    %cst_21 = arith.constant 0.000000e+00 : f32
    %cst_22 = arith.constant 6.000000e+00 : f32
    %87 = vector.broadcast %cst_21 : f32 to vector<32x128xf32>
    %88 = arith.maximumf %87, %86 : vector<32x128xf32>
    %89 = vector.broadcast %cst_22 : f32 to vector<32x128xf32>
    %90 = arith.minimumf %89, %88 : vector<32x128xf32>
    %c0_23 = arith.constant 0 : index
    %c0_24 = arith.constant 0 : index
    %91 = vector.load %arg6[%c0_23, %c0_24] : memref<128x128xf32, #tpu.memory_space<vmem>>, vector<128x128xf32>
    %cst_25 = arith.constant dense<0.000000e+00> : vector<32x128xf32>
    %92 = tpu.matmul %90, %91, %cst_25 {dimension_numbers = #tpu.dot_dimension_numbers<[1], [0], [0], [1], [0, 0, 1, 1], [], []>} : vector<32x128xf32>, vector<128x128xf32>, vector<32x128xf32> -> vector<32x128xf32>
    %c0_26 = arith.constant 0 : index
    %c0_27 = arith.constant 0 : index
    %93 = vector.load %arg7[%c0_26, %c0_27] : memref<1x128xf32, #tpu.memory_space<vmem>>, vector<1x128xf32>
    %94 = vector.broadcast %93 : vector<1x128xf32> to vector<32x128xf32>
    %95 = arith.addf %92, %94 : vector<32x128xf32>
    %96 = arith.addf %95, %1 : vector<32x128xf32>
    %97 = vector.shape_cast %96 : vector<32x128xf32> to vector<2x16x128xf32>
    %c0_28 = arith.constant 0 : index
    %c0_29 = arith.constant 0 : index
    %c0_30 = arith.constant 0 : index
    %98 = vector.load %arg8[%c0_28, %c0_29, %c0_30] : memref<2x16x128xf32, #tpu.memory_space<vmem>>, vector<2x16x128xf32>
    tpu.vector_store %arg8[%c0_28, %c0_29, %c0_30], %97 {strides = array<i32>} : memref<2x16x128xf32, #tpu.memory_space<vmem>>, vector<2x16x128xf32>,
    return
  }
  func.func @transform_0(%arg0: i32) -> (i32, i32, i32) {
    %c0_i32 = arith.constant 0 : i32
    %c0_i32_0 = arith.constant 0 : i32
    %c0_i32_1 = arith.constant 0 : i32
    return %arg0, %c0_i32, %c0_i32_0 : i32, i32, i32
  }
  func.func @transform_1(%arg0: i32) -> (i32, i32) {
    %c0_i32 = arith.constant 0 : i32
    %c0_i32_0 = arith.constant 0 : i32
    %c0_i32_1 = arith.constant 0 : i32
    return %c0_i32, %c0_i32_0 : i32, i32
  }
  func.func @transform_2(%arg0: i32) -> (i32, i32) {
    %c0_i32 = arith.constant 0 : i32
    %c0_i32_0 = arith.constant 0 : i32
    %c0_i32_1 = arith.constant 0 : i32
    return %c0_i32, %c0_i32_0 : i32, i32
  }
  func.func @transform_3(%arg0: i32) -> (i32, i32) {
    %c0_i32 = arith.constant 0 : i32
    %c0_i32_0 = arith.constant 0 : i32
    %c0_i32_1 = arith.constant 0 : i32
    return %c0_i32, %c0_i32_0 : i32, i32
  }
  func.func @transform_4(%arg0: i32) -> (i32, i32) {
    %c0_i32 = arith.constant 0 : i32
    %c0_i32_0 = arith.constant 0 : i32
    %c0_i32_1 = arith.constant 0 : i32
    return %c0_i32, %c0_i32_0 : i32, i32
  }
  func.func @transform_5(%arg0: i32) -> (i32, i32) {
    %c0_i32 = arith.constant 0 : i32
    %c0_i32_0 = arith.constant 0 : i32
    %c0_i32_1 = arith.constant 0 : i32
    return %c0_i32, %c0_i32_0 : i32, i32
  }
  func.func @transform_6(%arg0: i32) -> (i32, i32) {
    %c0_i32 = arith.constant 0 : i32
    %c0_i32_0 = arith.constant 0 : i32
    %c0_i32_1 = arith.constant 0 : i32
    return %c0_i32, %c0_i32_0 : i32, i32
  }
  func.func @transform_7(%arg0: i32) -> (i32, i32, i32) {
    %c0_i32 = arith.constant 0 : i32
    %c0_i32_0 = arith.constant 0 : i32
    %c0_i32_1 = arith.constant 0 : i32
    return %arg0, %c0_i32, %c0_i32_0 : i32, i32, i32
  }
}

</mosaic_0001>

<bundles_post_ra>
// kernel: tpu_custom_call.1
= control target key start
LH: loop header
LB: loop body
LE: loop exit
PB: predicated region body
PF: predicated region fallthrough
CT: control target
= control target key end

     0   :  { %12 = vsyncpa [#allocation3], 0  ;;  %s947_s0 = inlined_call_operand.hbm [shape: f32[2,16,128], index: 0, kind: input, shape index: {}]   ;;  %s948_s1 = inlined_call_operand.hbm [shape: f32[128,128], index: 1, kind: input, shape index: {}]   ;;  %s949_s2 = inlined_call_operand.vmem [shape: f32[1,128], index: 2, kind: input, shape index: {}]   ;;  %s950_s3 = inlined_call_operand.hbm [shape: f32[9,128], index: 3, kind: input, shape index: {}]   ;;  %s951_s4 = inlined_call_operand.vmem [shape: f32[1,128], index: 4, kind: input, shape index: {}]   ;;  %s952_s5 = inlined_call_operand.hbm [shape: f32[128,128], index: 5, kind: input, shape index: {}]   ;;  %s953_s6 = inlined_call_operand.vmem [shape: f32[1,128], index: 6, kind: input, shape index: {}]   ;;  %s954_s7 = inlined_call_operand.hbm [shape: f32[2,16,128], index: 7, kind: output, shape index: {}]  }
   0x1   :  { %13 = vsyncpa [#allocation6], 0 }
   0x2   :  { %14 = vsyncpa [#allocation9], 0 }
   0x3   :  { %15 = vsyncpa [#allocation4], 0  ;;  %s33_s26 = sshll.u32 %s948_s1, 4  ;;  %s652_s27 = smov [#allocation5]   ;;  %s34_s26 = int_to_ptr.hbm [resolvable:$true] %s33_s26 }
   0x4   :  { %s35_s28 = sshll.u32 %s652_s27, 4  ;;  %s20_s8 = sshll.u32 %s947_s0, 4  ;;  %s36_s28 = int_to_ptr.vmem [resolvable:$true] %s35_s28  ;;  %s21_s8 = int_to_ptr.hbm [resolvable:$true] %s20_s8 }
   0x5   :  { %s653_s9 = smov 128   ;;  %s654_s10 = smov 8  }
   0x6   :  { %41 = dma.hbm_to_vmem [thread:$0]  %s34_s26, 2048, %s36_s28, [#allocation6], %s653_s9, %s653_s9, %s654_s10  }
   0x7   :  { %s655_s11 = smov [#allocation2]   ;;  %s48_s1 = sshll.u32 %s950_s3, 4  ;;  %s49_s1 = int_to_ptr.hbm [resolvable:$true] %s48_s1 }
   0x8   :  { %s22_s12 = sshll.u32 %s655_s11, 4  ;;  %s63_s16 = sshll.u32 %s952_s5, 4  ;;  %s23_s12 = int_to_ptr.vmem [resolvable:$true] %s22_s12  ;;  %s64_s16 = int_to_ptr.hbm [resolvable:$true] %s63_s16 }
   0x9   :  { %28 = dma.hbm_to_vmem [thread:$0]  %s21_s8, 512, %s23_s12, [#allocation3], %s653_s9, %s653_s9, %s654_s10  }
   0xa   :  { %s656_s17 = smov [#allocation7]   ;;  %s657_s19 = smov [#allocation8]  }
   0xb   :  { %s50_s18 = sshll.u32 %s656_s17, 4  ;;  %s65_s3 = sshll.u32 %s657_s19, 4  ;;  %s51_s18 = int_to_ptr.vmem [resolvable:$true] %s50_s18  ;;  %s66_s3 = int_to_ptr.vmem [resolvable:$true] %s65_s3 }
   0xc   :  { %56 = dma.hbm_to_vmem [thread:$0]  %s49_s1, 256, %s51_s18, [#allocation6], %s653_s9, %s653_s9, %s654_s10  }
   0xd   :  { %71 = dma.hbm_to_vmem [thread:$0]  %s64_s16, 2048, %s66_s3, [#allocation9], %s653_s9, %s653_s9, %s654_s10  }
   0xe   :  { %644 = dma.done.wait [#allocation3], 512  }
   0xf   :  { %645 = vsyncadd [#allocation3], 4294966784 }
  0x10   :  { %646 = dma.done.wait [#allocation6], 2304  }
  0x11   :  { %647 = vsyncadd [#allocation6], 4294964992 }
  0x12   :  { %648 = dma.done.wait [#allocation9], 2048  }
  0x13   :  { %649 = vsyncadd [#allocation9], 4294965248  ;;  %v109_v0 = vld [vmem:[#allocation5 + $0x78] sm:$0xff]  ;;  %v108_v1 = vld [vmem:[#allocation5 + $0x70] sm:$0xff]  ;;  %v151_v25 = vlaneseq  ;;  %s658_s21 = smov 120   ;;  %s660_s24 = smov [#allocation10]  }
  0x14   :  { %114 = vmatpush.msra.mxu0 %v109_v0  ;;  %479 = vmatpush.msra.mxu2 %v109_v0  ;;  %v107_v2 = vld [vmem:[#allocation5 + $0x68] sm:$0xff]  ;;  %v106_v3 = vld [vmem:[#allocation5 + $0x60] sm:$0xff]  ;;  %v105_v4 = vld [vmem:[#allocation5 + $0x58] sm:$0xff]  ;;  %s458_s25 = sshll.u32 %s660_s24, 4  ;;  %s459_s25 = int_to_ptr.vmem [resolvable:$true] %s458_s25 }
  0x15   :  { %v104_v5 = vld [vmem:[#allocation5 + $0x50] sm:$0xff]  ;;  %v103_v6 = vld [vmem:[#allocation5 + $0x48] sm:$0xff]  ;;  %v102_v7 = vld [vmem:[#allocation5 + $0x40] sm:$0xff]  ;;  %v742_v31 = vshrl.u32 %v151_v25, 7 }
  0x16   :  { %115 = vmatpush.msra.mxu0 %v108_v1  ;;  %480 = vmatpush.msra.mxu2 %v108_v1  ;;  %v101_v8 = vld [vmem:[#allocation5 + $0x38] sm:$0xff]  ;;  %v100_v9 = vld [vmem:[#allocation5 + $0x30] sm:$0xff]  ;;  %v99_v10 = vld [vmem:[#allocation5 + $0x28] sm:$0xff] }
  0x17   :  { %v98_v11 = vld [vmem:[#allocation5 + $0x20] sm:$0xff]  ;;  %v97_v12 = vld [vmem:[#allocation5 + $0x18] sm:$0xff]  ;;  %v96_v13 = vld [vmem:[#allocation5 + $0x10] sm:$0xff]  ;;  %vm250_vm0 = vcmp.lt.s32.totalorder %v742_v31, 1  ;;  %vm275_vm1 = vcmp.lt.s32.totalorder %v742_v31, 7 }
  0x18   :  { %116 = vmatpush.msra.mxu0 %v107_v2  ;;  %481 = vmatpush.msra.mxu2 %v107_v2  ;;  %v95_v14 = vld [vmem:[#allocation5 + $0x8] sm:$0xff]  ;;  %v94_v15 = vld [vmem:[#allocation5] sm:$0xff]  ;;  %v727_v17 = vld [vmem:[#allocation2 + $0x10] sm:$0xff] }
  0x19   :  { %v725_v16 = vld [vmem:[#allocation2] sm:$0xff]  ;;  %v731_v18 = vld [vmem:[#allocation2 + $0x8] sm:$0xff]  ;;  %v733_v19 = vld [vmem:[#allocation2 + $0x18] sm:$0xff] }
  0x1a   :  { %117 = vmatpush.msra.mxu0 %v106_v3  ;;  %482 = vmatpush.msra.mxu2 %v106_v3  ;;  %v520_v20 = vld [vmem:[%s949_s2] ss:$0 sm:$0xff]  ;;  %v412_v55 = vld [vmem:[#allocation8 + $0x78] sm:$0xff]  ;;  %v410_v57 = vld [vmem:[#allocation8 + $0x68] sm:$0xff] }
  0x1b   :  { %495 = vmatpush.msra.mxu3 %v412_v55  ;;  %417 = vmatpush.msra.mxu1 %v412_v55  ;;  %v411_v56 = vld [vmem:[#allocation8 + $0x70] sm:$0xff]  ;;  %v409_v58 = vld [vmem:[#allocation8 + $0x60] sm:$0xff]  ;;  %v408_v59 = vld [vmem:[#allocation8 + $0x58] sm:$0xff] }
  0x1c   :  { %118 = vmatpush.msra.mxu0 %v105_v4  ;;  %483 = vmatpush.msra.mxu2 %v105_v4  ;;  %v407_v60 = vld [vmem:[#allocation8 + $0x50] sm:$0xff]  ;;  %v406_v61 = vld [vmem:[#allocation8 + $0x48] sm:$0xff]  ;;  %v405_v62 = vld [vmem:[#allocation8 + $0x40] sm:$0xff] }
  0x1d   :  { %496 = vmatpush.msra.mxu3 %v411_v56  ;;  %418 = vmatpush.msra.mxu1 %v411_v56  ;;  %v404_v63 = vld [vmem:[#allocation8 + $0x38] sm:$0xff]  ;;  %v403_v0 = vld [vmem:[#allocation8 + $0x30] sm:$0xff]  ;;  %v402_v2 = vld [vmem:[#allocation8 + $0x28] sm:$0xff] }
  0x1e   :  { %119 = vmatpush.msra.mxu0 %v104_v5  ;;  %484 = vmatpush.msra.mxu2 %v104_v5  ;;  %v228_v3 = vld [vmem:[#allocation7] sm:$0xff]  ;;  %v401_v4 = vld [vmem:[#allocation8 + $0x20] sm:$0xff]  ;;  %v400_v5 = vld [vmem:[#allocation8 + $0x18] sm:$0xff] }
  0x1f   :  { %497 = vmatpush.msra.mxu3 %v410_v57  ;;  %419 = vmatpush.msra.mxu1 %v410_v57  ;;  %v310_v55 = vperm.slane %v228_v3, 5  ;;  %v867_v56 = vperm.slane %v228_v3, 2 }
  0x20   :  { %120 = vmatpush.msra.mxu0 %v103_v6  ;;  %485 = vmatpush.msra.mxu2 %v103_v6  ;;  %v296_v6 = vperm.slane %v228_v3, 4 }
  0x21   :  { %498 = vmatpush.msra.mxu3 %v409_v58  ;;  %420 = vmatpush.msra.mxu1 %v409_v58  ;;  %v659_v58 = vmov 0.0  }
  0x22   :  { %121 = vmatpush.msra.mxu0 %v102_v7  ;;  %486 = vmatpush.msra.mxu2 %v102_v7  ;;  %v399_v7 = vld [vmem:[#allocation8 + $0x10] sm:$0xff] }
  0x23   :  { %499 = vmatpush.msra.mxu3 %v408_v59  ;;  %421 = vmatpush.msra.mxu1 %v408_v59 }
  0x24   :  { %122 = vmatpush.msra.mxu0 %v101_v8  ;;  %487 = vmatpush.msra.mxu2 %v101_v8  ;;  %v332_v8 = vperm.slane %v228_v3, 1 }
  0x25   :  { %500 = vmatpush.msra.mxu3 %v407_v60  ;;  %422 = vmatpush.msra.mxu1 %v407_v60 }
  0x26   :  { %123 = vmatpush.msra.mxu0 %v100_v9  ;;  %488 = vmatpush.msra.mxu2 %v100_v9  ;;  %v398_v9 = vld [vmem:[#allocation8 + $0x8] sm:$0xff] }
  0x27   :  { %501 = vmatpush.msra.mxu3 %v406_v61  ;;  %423 = vmatpush.msra.mxu1 %v406_v61 }
  0x28   :  { %124 = vmatpush.msra.mxu0 %v99_v10  ;;  %489 = vmatpush.msra.mxu2 %v99_v10  ;;  %v154_v10 = vadd.s32 16, %v742_v31 }
  0x29   :  { %502 = vmatpush.msra.mxu3 %v405_v62  ;;  %424 = vmatpush.msra.mxu1 %v405_v62 }
  0x2a   :  { %125 = vmatpush.msra.mxu0 %v98_v11  ;;  %490 = vmatpush.msra.mxu2 %v98_v11  ;;  %v355_v11 = vperm.slane %v228_v3, 7  ;;  %v174_v25 = vand.u32 15, %v154_v10 }
  0x2b   :  { %503 = vmatpush.msra.mxu3 %v404_v63  ;;  %425 = vmatpush.msra.mxu1 %v404_v63 }
  0x2c   :  { %126 = vmatpush.msra.mxu0 %v97_v12  ;;  %491 = vmatpush.msra.mxu2 %v97_v12  ;;  %v153_v12 = vadd.s32 8, %v742_v31  ;;  %vm852_vm2 = vcmp.ge.s32.totalorder %v174_v25, 1 }
  0x2d   :  { %504 = vmatpush.msra.mxu3 %v403_v0  ;;  %426 = vmatpush.msra.mxu1 %v403_v0  ;;  %v476_v59 = vsel %vm852_vm2, 1.0, %v659_v58 }
  0x2e   :  { %127 = vmatpush.msra.mxu0 %v96_v13  ;;  %492 = vmatpush.msra.mxu2 %v96_v13 }
  0x2f   :  { %505 = vmatpush.msra.mxu3 %v402_v2  ;;  %427 = vmatpush.msra.mxu1 %v402_v2 }
  0x30   :  { %128 = vmatpush.msra.mxu0 %v95_v14  ;;  %493 = vmatpush.msra.mxu2 %v95_v14  ;;  %v397_v14 = vld [vmem:[#allocation8] sm:$0xff] }
  0x31   :  { %506 = vmatpush.msra.mxu3 %v401_v4  ;;  %428 = vmatpush.msra.mxu1 %v401_v4 }
  0x32   :  { %129 = vmatpush.msra.mxu0 %v94_v15  ;;  %494 = vmatpush.msra.mxu2 %v94_v15  ;;  %v155_v15 = vadd.s32 24, %v742_v31 }
  0x33   :  { %130 = vmatmul.f32.vlgmr.msra.gmra.mxu0 %v725_v16  ;;  %136 = vmatmul.f32.vlgmr.msra.gmra.mxu2 %v727_v17 }
  0x34   :  { %507 = vmatpush.msra.mxu3 %v400_v5  ;;  %429 = vmatpush.msra.mxu1 %v400_v5 }
  0x36   :  { %508 = vmatpush.msra.mxu3 %v399_v7  ;;  %430 = vmatpush.msra.mxu1 %v399_v7 }
  0x38   :  { %509 = vmatpush.msra.mxu3 %v398_v9  ;;  %431 = vmatpush.msra.mxu1 %v398_v9 }
  0x3a   :  { %510 = vmatpush.msra.mxu3 %v397_v14  ;;  %432 = vmatpush.msra.mxu1 %v397_v14 }
  0x3b   :  { %133 = vmatmul.f32.gmra.mxu0 %v731_v18  ;;  %139 = vmatmul.f32.gmra.mxu2 %v733_v19 }
  0xb0   :  { %v131_v21 = vpop.f32.mrf.mxu0 }
  0xb1   :  { %v132_v22 = vadd.f32 %v520_v20, %v131_v21 }
  0xb3   :  { %v143_v23 = vmax.f32 %v132_v22, 0.0 }
  0xb5   :  { %v740_v30 = vmin.f32 %v143_v23, 6.0 }
  0xb6   :  { %v137_v24 = vpop.f32.mrf.mxu2 }
  0xb7   :  { %v138_v26 = vadd.f32 %v520_v20, %v137_v24  ;;  %v246_v35 = vrot.slane %v740_v30, 7  ;;  %v271_v37 = vrot.slane %v740_v30, 1  ;;  %v297_v13 = vmul.f32 %v296_v6, %v740_v30 }
  0xb8   :  { %v134_v27 = vpop.f32.mrf.mxu0 }
  0xb9   :  { %v145_v28 = vmax.f32 %v138_v26, 0.0  ;;  %v135_v29 = vadd.f32 %v520_v20, %v134_v27  ;;  %v167_v27 = vand.u32 15, %v153_v12 }
  0xbb   :  { %v744_v32 = vmin.f32 %v145_v28, 6.0  ;;  %v144_v33 = vmax.f32 %v135_v29, 0.0  ;;  %vm856_vm3 = vcmp.le.s32.totalorder %v167_v27, 14 }
  0xbc   :  { %v877_v61 = vsel %vm856_vm3, 1.0, %v659_v58 }
  0xbd   :  { %v746_v34 = vmin.f32 %v144_v33, 6.0  ;;  %242 = vrot.lane.b32.xlu1 %v744_v32, %s658_s21  ;;  %234 = vrot.lane.b32.xlu0 %v744_v32, %s654_s10  ;;  %v248_v38 = vrot.slane %v744_v32, 7  ;;  %v273_v42 = vrot.slane %v744_v32, 1  ;;  %v299_v21 = vmul.f32 %v296_v6, %v744_v32 }
  0xbe   :  { %v140_v36 = vpop.f32.mrf.mxu2  ;;  %v160_v32 = vand.u32 15, %v742_v31 }
  0xbf   :  { %v247_v39 = vrot.slane %v746_v34, 7  ;;  %v141_v40 = vadd.f32 %v520_v20, %v140_v36  ;;  %v272_v41 = vrot.slane %v746_v34, 1  ;;  %v814_v20 = vperm.slane %v228_v3, 3 }
  0xc0   :  { %v818_v22 = vmul.f32 %v296_v6, %v746_v34  ;;  %vm204_vm4 = vcmp.ge.s32.totalorder %v160_v32, 1 }
  0xc1   :  { %v146_v43 = vmax.f32 %v141_v40, 0.0  ;;  %v762_v44 = vsel %vm250_vm0, %v247_v39, %v248_v38  ;;  %v766_v45 = vsel %vm275_vm1, %v271_v37, %v272_v41  ;;  %v770_v46 = vsel %vm250_vm0, %v246_v35, %v247_v39 }
  0xc2   :  { %v774_v47 = vsel %vm275_vm1, %v272_v41, %v273_v42  ;;  %v821_v23 = vmul.f32 %v332_v8, %v762_v44  ;;  %v826_v26 = vmul.f32 %v355_v11, %v766_v45  ;;  %v829_v28 = vmul.f32 %v332_v8, %v770_v46 }
  0xc3   :  { %v776_v48 = vmin.f32 %v146_v43, 6.0  ;;  %v837_v33 = vmul.f32 %v355_v11, %v774_v47  ;;  %v873_v60 = vsel %vm204_vm4, 1.0, %v659_v58 }
  0xc5   :  { %v249_v49 = vrot.slane %v776_v48, 7  ;;  %236 = vrot.lane.b32.xlu2 %v776_v48, %s654_s10  ;;  %240 = vrot.lane.b32.xlu1 %v746_v34, %s658_s21  ;;  %v274_v50 = vrot.slane %v776_v48, 1  ;;  %v300_v29 = vmul.f32 %v296_v6, %v776_v48 }
  0xc6   :  { %232 = vrot.lane.b32.xlu0 %v746_v34, %s654_s10 }
  0xc7   :  { %v788_v51 = vsel %vm250_vm0, %v249_v49, %v246_v35  ;;  %v792_v52 = vsel %vm275_vm1, %v273_v42, %v274_v50  ;;  %v796_v53 = vsel %vm250_vm0, %v248_v38, %v249_v49  ;;  %v800_v54 = vsel %vm275_vm1, %v274_v50, %v271_v37 }
  0xc8   :  { %v842_v36 = vmul.f32 %v355_v11, %v792_v52  ;;  %v181_v37 = vand.u32 15, %v155_v15  ;;  %v336_v38 = vmul.f32 %v332_v8, %v796_v53  ;;  %v359_v39 = vmul.f32 %v355_v11, %v800_v54 }
  0xc9   :  { %v327_v50 = vperm.slane %v228_v3, 0 }
  0xca   :  { %vm219_vm5 = vcmp.le.s32.totalorder %v181_v37, 14  ;;  %v522_v37 = vld [vmem:[#allocation7 + $0x8] ss:$0 sm:$0xff] }
  0xcd   :  { %238 = vrot.lane.b32.xlu1 %v740_v30, %s658_s21  ;;  %230 = vrot.lane.b32.xlu2 %v740_v30, %s654_s10  ;;  %v833_v30 = vmul.f32 %v332_v8, %v788_v51  ;;  %v350_v51 = vperm.slane %v228_v3, 6 }
  0xce   :  { %244 = vrot.lane.b32.xlu0 %v776_v48, %s658_s21 }
 0x11f   :  { %v808_v1 = vpop.permute.xlu2 %236 }
 0x120   :  { %v258_v40 = vrot.slane %v808_v1, 7  ;;  %v283_v41 = vrot.slane %v808_v1, 1  ;;  %v305_v44 = vmul.f32 %v814_v20, %v808_v1  ;;  %v883_v1 = vsel %vm219_vm5, 1.0, %v659_v58 }
 0x122   :  { %v869_v57 = vadd.f32 %v305_v44, %v300_v29 }
 0x127   :  { %v823_v24 = vpop.permute.xlu2 %230 }
 0x128   :  { %v255_v42 = vrot.slane %v823_v24, 7  ;;  %v280_v43 = vrot.slane %v823_v24, 1  ;;  %v302_v47 = vmul.f32 %v814_v20, %v823_v24 }
 0x12a   :  { %v262_v53 = vsel %vm250_vm0, %v258_v40, %v255_v42  ;;  %v287_v54 = vsel %vm275_vm1, %v283_v41, %v280_v43  ;;  %v879_v62 = vadd.f32 %v302_v47, %v297_v13 }
 0x12b   :  { %v328_v2 = vmul.f32 %v327_v50, %v262_v53  ;;  %v354_v3 = vmul.f32 %v350_v51, %v287_v54 }
 0x12d   :  { %v337_v46 = vadd.f32 %v833_v30, %v328_v2 }
 0x12f   :  { %v839_v34 = vpop.permute.xlu1 %242  ;;  %v235_v35 = vpop.permute.xlu0 %234 }
 0x130   :  { %v257_v48 = vrot.slane %v235_v35, 7  ;;  %v304_v49 = vmul.f32 %v814_v20, %v235_v35  ;;  %v282_v52 = vrot.slane %v235_v35, 1  ;;  %v265_v4 = vrot.slane %v839_v34, 7 }
 0x131   :  { %v290_v7 = vrot.slane %v839_v34, 1  ;;  %v313_v8 = vmul.f32 %v310_v55, %v839_v34 }
 0x132   :  { %v259_v63 = vsel %vm250_vm0, %v257_v48, %v258_v40  ;;  %v308_v0 = vadd.f32 %v304_v49, %v299_v21  ;;  %v284_v5 = vsel %vm275_vm1, %v282_v52, %v283_v41 }
 0x133   :  { %v331_v12 = vmul.f32 %v327_v50, %v259_v63  ;;  %v353_v27 = vmul.f32 %v350_v51, %v284_v5 }
 0x134   :  { %v317_v21 = vadd.f32 %v313_v8, %v308_v0 }
 0x135   :  { %v362_v54 = vadd.f32 %v842_v36, %v353_v27 }
 0x137   :  { %v241_v6 = vpop.permute.xlu1 %240 }
 0x138   :  { %v264_v9 = vrot.slane %v241_v6, 7  ;;  %v289_v10 = vrot.slane %v241_v6, 1  ;;  %v233_v11 = vpop.permute.xlu0 %232  ;;  %v312_v25 = vmul.f32 %v310_v55, %v241_v6 }
 0x139   :  { %v256_v13 = vrot.slane %v233_v11, 7  ;;  %v281_v14 = vrot.slane %v233_v11, 1  ;;  %v303_v15 = vmul.f32 %v814_v20, %v233_v11  ;;  %v521_v20 = vld [vmem:[%s951_s4] ss:$0 sm:$0xff] }
 0x13a   :  { %v268_v24 = vsel %vm250_vm0, %v264_v9, %v265_v4  ;;  %v293_v29 = vsel %vm275_vm1, %v289_v10, %v290_v7  ;;  %v325_v63 = vadd.f32 %v521_v20, %v317_v21 }
 0x13b   :  { %v260_v32 = vsel %vm250_vm0, %v256_v13, %v257_v48  ;;  %v261_v34 = vsel %vm250_vm0, %v255_v42, %v256_v13  ;;  %v285_v35 = vsel %vm275_vm1, %v281_v14, %v282_v52  ;;  %v286_v40 = vsel %vm275_vm1, %v280_v43, %v281_v14 }
 0x13c   :  { %v307_v41 = vadd.f32 %v303_v15, %v818_v22  ;;  %v329_v44 = vmul.f32 %v327_v50, %v261_v34  ;;  %v330_v45 = vmul.f32 %v327_v50, %v260_v32  ;;  %v352_v47 = vmul.f32 %v350_v51, %v285_v35 }
 0x13d   :  { %v340_v48 = vadd.f32 %v336_v38, %v331_v12  ;;  %v363_v42 = vadd.f32 %v359_v39, %v354_v3  ;;  %v344_v49 = vmul.f32 %v867_v56, %v268_v24  ;;  %v351_v0 = vmul.f32 %v350_v51, %v286_v40 }
 0x13e   :  { %v316_v52 = vadd.f32 %v312_v25, %v307_v41  ;;  %v339_v53 = vadd.f32 %v821_v23, %v330_v45  ;;  %v338_v43 = vadd.f32 %v829_v28, %v329_v44  ;;  %v366_v22 = vmul.f32 %v522_v37, %v293_v29 }
 0x13f   :  { %v239_v58 = vpop.permute.xlu1 %238  ;;  %v361_v8 = vadd.f32 %v837_v33, %v352_v47  ;;  %v360_v31 = vadd.f32 %v826_v26, %v351_v0 }
 0x140   :  { %v245_v5 = vpop.permute.xlu0 %244  ;;  %v263_v50 = vrot.slane %v239_v58, 7  ;;  %v288_v6 = vrot.slane %v239_v58, 1  ;;  %v311_v30 = vmul.f32 %v310_v55, %v239_v58  ;;  %v348_v2 = vadd.f32 %v344_v49, %v339_v53 }
 0x141   :  { %v266_v38 = vrot.slane %v245_v5, 7  ;;  %v291_v39 = vrot.slane %v245_v5, 1  ;;  %v314_v3 = vmul.f32 %v310_v55, %v245_v5  ;;  %v324_v11 = vadd.f32 %v521_v20, %v316_v52 }
 0x142   :  { %v269_v23 = vsel %vm250_vm0, %v263_v50, %v264_v9  ;;  %v294_v36 = vsel %vm275_vm1, %v288_v6, %v289_v10  ;;  %v375_v51 = vmul.f32 %v476_v59, %v348_v2  ;;  %v315_v10 = vadd.f32 %v311_v30, %v879_v62 }
 0x143   :  { %v267_v28 = vsel %vm250_vm0, %v265_v4, %v266_v38  ;;  %v292_v12 = vsel %vm275_vm1, %v290_v7, %v291_v39  ;;  %v318_v13 = vadd.f32 %v314_v3, %v869_v57  ;;  %v270_v55 = vsel %vm250_vm0, %v266_v38, %v263_v50 }
 0x144   :  { %v345_v33 = vmul.f32 %v867_v56, %v267_v28  ;;  %v295_v9 = vsel %vm275_vm1, %v291_v39, %v288_v6  ;;  %v342_v59 = vmul.f32 %v867_v56, %v270_v55  ;;  %v343_v4 = vmul.f32 %v867_v56, %v269_v23 }
 0x145   :  { %v326_v14 = vadd.f32 %v521_v20, %v318_v13  ;;  %v368_v15 = vmul.f32 %v522_v37, %v295_v9  ;;  %v367_v21 = vmul.f32 %v522_v37, %v292_v12  ;;  %v379_v7 = vadd.f32 %v375_v51, %v325_v63 }
 0x146   :  { %v346_v24 = vadd.f32 %v342_v59, %v337_v46  ;;  %v365_v57 = vmul.f32 %v522_v37, %v294_v36  ;;  %v349_v25 = vadd.f32 %v345_v33, %v340_v48  ;;  %v347_v32 = vadd.f32 %v343_v4, %v338_v43 }
 0x147   :  { %v371_v27 = vadd.f32 %v367_v21, %v362_v54  ;;  %v372_v29 = vadd.f32 %v368_v15, %v363_v42  ;;  %v370_v34 = vadd.f32 %v366_v22, %v361_v8  ;;  %v323_v35 = vadd.f32 %v521_v20, %v315_v10 }
 0x148   :  { %v373_v62 = vmul.f32 %v873_v60, %v346_v24  ;;  %v380_v40 = vadd.f32 %v349_v25, %v326_v14  ;;  %v378_v56 = vadd.f32 %v347_v32, %v324_v11  ;;  %v369_v47 = vadd.f32 %v365_v57, %v360_v31 }
 0x149   :  { %v387_v41 = vadd.f32 %v379_v7, %v371_v27  ;;  %v384_v44 = vmul.f32 %v883_v1, %v372_v29  ;;  %v382_v45 = vmul.f32 %v877_v61, %v370_v34  ;;  %v523_v61 = vld [vmem:[%s953_s6] ss:$0 sm:$0xff]  ;;  %s460_s6 = sshll.u32 %s954_s7, 4  ;;  %s461_s6 = int_to_ptr.hbm [resolvable:$true] %s460_s6 }
 0x14a   :  { %v377_v46 = vadd.f32 %v373_v62, %v323_v35 }
 0x14b   :  { %v391_v37 = vmax.f32 %v387_v41, 0.0  ;;  %v388_v48 = vadd.f32 %v384_v44, %v380_v40  ;;  %v386_v49 = vadd.f32 %v382_v45, %v378_v56 }
 0x14c   :  { %v385_v42 = vadd.f32 %v377_v46, %v369_v47 }
 0x14d   :  { %v395_v52 = vmin.f32 %v391_v37, 6.0  ;;  %v392_v26 = vmax.f32 %v388_v48, 0.0  ;;  %v390_v60 = vmax.f32 %v386_v49, 0.0 }
 0x14e   :  { %v389_v53 = vmax.f32 %v385_v42, 0.0 }
 0x14f   :  { %439 = vmatmul.f32.vlgmr.msra.gmra.mxu3 %v395_v52  ;;  %v396_v54 = vmin.f32 %v392_v26, 6.0  ;;  %v394_v58 = vmin.f32 %v390_v60, 6.0 }
 0x150   :  { %v393_v20 = vmin.f32 %v389_v53, 6.0 }
 0x152   :  { %433 = vmatmul.f32.vlgmr.msra.gmra.mxu1 %v393_v20 }
 0x157   :  { %442 = vmatmul.f32.gmra.mxu3 %v396_v54 }
 0x15a   :  { %436 = vmatmul.f32.gmra.mxu1 %v394_v58 }
 0x1cf   :  { %v434_v1 = vpop.f32.mrf.mxu1 }
 0x1d0   :  { %v435_v63 = vadd.f32 %v523_v61, %v434_v1 }
 0x1d2   :  { %v446_v0 = vadd.f32 %v435_v63, %v725_v16  ;;  %v440_v43 = vpop.f32.mrf.mxu3 }
 0x1d3   :  { %v441_v22 = vadd.f32 %v523_v61, %v440_v43 }
 0x1d4   :  { %450 = vst [vmem:[#allocation10] sm:$0xff] %v446_v0 }
 0x1d5   :  { %v448_v5 = vadd.f32 %v441_v22, %v727_v17 }
 0x1d7   :  { %452 = vst [vmem:[#allocation10 + $0x10] sm:$0xff] %v448_v5  ;;  %v437_v50 = vpop.f32.mrf.mxu1 }
 0x1d8   :  { %v438_v6 = vadd.f32 %v523_v61, %v437_v50 }
 0x1da   :  { %v447_v30 = vadd.f32 %v438_v6, %v731_v18  ;;  %v443_v2 = vpop.f32.mrf.mxu3 }
 0x1db   :  { %v444_v38 = vadd.f32 %v523_v61, %v443_v2 }
 0x1dc   :  { %451 = vst [vmem:[#allocation10 + $0x8] sm:$0xff] %v447_v30 }
 0x1dd   :  { %v449_v16 = vadd.f32 %v444_v38, %v733_v19 }
 0x1df   :  { %453 = vst [vmem:[#allocation10 + $0x18] sm:$0xff] %v449_v16 }
 0x1e0   :  { %466 = dma.vmem_to_hbm [thread:$0]  %s459_s25, 512, %s461_s6, [#allocation4], %s653_s9, %s653_s9, %s654_s10  }
 0x1e1   :  { %650 = dma.done.wait [#allocation4], 512  }
 0x1e2   :  { %651 = vsyncadd [#allocation4], 4294966784 }
 0x1e3   :  { %471 = vsyncpa [#allocation3], 1 }
 0x1e4   :  { %472 = vsyncpa [#allocation6], 1 }
 0x1e5   :  { %473 = vsyncpa [#allocation9], 1 }
 0x1e6   :  { %474 = vsyncpa [#allocation4], 1 }

</bundles_post_ra>
